<compile_context>
chip_gen: v5e
topology: v5e:2x2
jax: 0.10.0
libtpu: 0.0.40
codegen_flags: <defaults>
</compile_context>

<pallas_src>
import jax
import jax.numpy as jnp
from jax.experimental import pallas as pl
from jax.experimental.pallas import tpu as pltpu


def _round_up(v, m):
    return ((v + m - 1) // m) * m


def _cdiv(a, b):
    return (a + b - 1) // b


# Flipped to False (and cached) if this jax build rejects pipeline_mode=Buffered(1).
_SINGLE_BUFFER_WEIGHTS = [True]


# -----------------------------------------------------------------------------
# Kernel: fused fc1 -> bn1 -> relu -> fc2 -> bn2 -> +residual -> relu
# -----------------------------------------------------------------------------
def residual_block_kernel(x_ref, w1_ref, t1_ref, w2_ref, t2_ref, out_ref):
    """x_ref:(tile_n,Dp) f32; w*: (Dp,Dp) folded weights; t*: (1,Dp) folded shifts."""
    x = x_ref[...]                                           # f32 residual
    h = jnp.dot(x.astype(w1_ref.dtype), w1_ref[...],
                preferred_element_type=jnp.float32)
    h = jnp.maximum(h + t1_ref[...], 0.0)
    o = jnp.dot(h.astype(w2_ref.dtype), w2_ref[...],
                preferred_element_type=jnp.float32)
    o = o + t2_ref[...] + x                                   # residual add (f32)
    out_ref[...] = jnp.maximum(o, 0.0).astype(out_ref.dtype)  # eval dropout = id


# -----------------------------------------------------------------------------
# One-time parameter preparation (hoisted out of the per-call forward)
# -----------------------------------------------------------------------------
def prepare_params(params, eps=1e-5, precision="bf16"):
    """Fold Linear bias + eval-mode BN into (W_t, shift), pad to lane-aligned Dp
    and cast weights to the MXU input dtype. Call once, reuse for every forward."""
    w_dtype = jnp.bfloat16 if precision == "bf16" else jnp.float32
    w_itemsize = 2 if precision == "bf16" else 4
    D = params["fc1_w"].shape[0]
    Dp = _round_up(D, 128)

    def fold(w, b, gamma, beta, mean, var):
        scale = gamma / jnp.sqrt(var + eps)          # (D,)
        shift = (b - mean) * scale + beta            # (D,)
        w_t = w.T * scale[None, :]                   # (in, out), per-out-col scale
        return w_t, shift

    w1_f, t1 = fold(params["fc1_w"], params["fc1_b"], params["bn1_gamma"],
                    params["bn1_beta"], params["bn1_mean"], params["bn1_var"])
    w2_f, t2 = fold(params["fc2_w"], params["fc2_b"], params["bn2_gamma"],
                    params["bn2_beta"], params["bn2_mean"], params["bn2_var"])

    pad = Dp - D
    return {
        "w1": jnp.pad(w1_f.astype(w_dtype), ((0, pad), (0, pad))),
        "w2": jnp.pad(w2_f.astype(w_dtype), ((0, pad), (0, pad))),
        "t1": jnp.pad(t1.astype(jnp.float32), (0, pad)).reshape(1, Dp),
        "t2": jnp.pad(t2.astype(jnp.float32), (0, pad)).reshape(1, Dp),
        "dim": D,
        "dim_padded": Dp,
        "w_itemsize": w_itemsize,
    }


# -----------------------------------------------------------------------------
# VMEM budgeting / tiling
# -----------------------------------------------------------------------------
def _vmem_limit_bytes():
    """Generation-aware VMEM limit: physical capacity minus compiler headroom."""
    try:
        cap = int(pltpu.get_tpu_info().vmem_capacity_bytes)
    except Exception:
        cap = 64 * 1024 * 1024          # conservative fallback (v7x: 64 MiB / TC)
    return max(cap - 16 * 1024 * 1024, 32 * 1024 * 1024)


def _pick_tile_n(N, Dp, w_itemsize, weight_buffers, vmem_budget, row_align=8):
    """Largest batch tile that fits VMEM after the resident weights/shifts."""
    n_pad = _round_up(max(int(N), 1), row_align)
    weight_bytes = weight_buffers * (2 * Dp * Dp * w_itemsize + 2 * Dp * 4)
    # Per-row VMEM: x & out double-buffered f32 (4*Dp*4) + f32 h/o intermediates
    # (2*Dp*4) + MXU-input casts of x and h (2*Dp*w_itemsize).
    per_row = Dp * (6 * 4 + 2 * w_itemsize)
    avail = vmem_budget - weight_bytes
    # TODO(synk): when avail <= 0 (very large D), stream W1/W2 K-slices from HBM
    # over an extra "arbitrary" grid axis with an f32 accumulator instead of
    # keeping the weights VMEM-resident (needed on v7x around Dp ~ 3.5k bf16).
    max_rows = max(avail // per_row, row_align)
    tile = int(min(1024, max_rows))
    if tile >= 256:
        tile = (tile // 256) * 256
    else:
        tile = max((tile // row_align) * row_align, row_align)
    if n_pad <= tile:
        tile = n_pad
        # v7x megacore: split a single large tile so both TensorCores get work.
        if tile >= 512:
            tile = _round_up(_cdiv(tile, 2), 256)
    return tile


# -----------------------------------------------------------------------------
# pallas_call wrapper
# -----------------------------------------------------------------------------
def _call_kernel(x_p, prepared, tile_n, Np, Dp, single_buffer_weights,
                 vmem_limit, out_dtype):
    grid_n = Np // tile_n

    if single_buffer_weights:
        # Constant index_map -> never re-fetched -> one buffer is enough.
        w_spec = pl.BlockSpec((Dp, Dp), lambda i: (0, 0),
                              pipeline_mode=pl.Buffered(1))
    else:
        w_spec = pl.BlockSpec((Dp, Dp), lambda i: (0, 0))
    t_spec = pl.BlockSpec((1, Dp), lambda i: (0, 0))
    x_spec = pl.BlockSpec((tile_n, Dp), lambda i: (i, 0))
    out_spec = pl.BlockSpec((tile_n, Dp), lambda i: (i, 0))

    w_itemsize = prepared["w_itemsize"]
    cost = pl.CostEstimate(
        flops=4 * Np * Dp * Dp,                     # two (Np,Dp)x(Dp,Dp) matmuls
        transcendentals=0,
        bytes_accessed=(Np * Dp * 4
                        + Np * Dp * jnp.dtype(out_dtype).itemsize
                        + 2 * Dp * Dp * w_itemsize + 2 * Dp * 4),
    )

    return pl.pallas_call(
        residual_block_kernel,
        out_shape=jax.ShapeDtypeStruct((Np, Dp), out_dtype),
        grid_spec=pltpu.PrefetchScalarGridSpec(
            num_scalar_prefetch=0,
            grid=(grid_n,),
            in_specs=[x_spec, w_spec, t_spec, w_spec, t_spec],
            out_specs=out_spec,
        ),
        compiler_params=pltpu.CompilerParams(
            dimension_semantics=("parallel",),      # megacore sharding on v7x
            vmem_limit_bytes=int(vmem_limit),
        ),
        cost_estimate=cost,
    )(x_p, prepared["w1"], prepared["t1"], prepared["w2"], prepared["t2"])


def residual_block_forward(x, prepared, out_dtype=None):
    """Eval-mode ResidualBlock forward. x: (N, D). `prepared` from prepare_params."""
    N, D = x.shape
    assert D == prepared["dim"], "prepared params were built for a different dim"
    Dp = prepared["dim_padded"]
    w_itemsize = prepared["w_itemsize"]
    out_dtype = jnp.dtype(x.dtype if out_dtype is None else out_dtype)
    row_align = 16 if out_dtype.itemsize < 4 else 8

    vmem_limit = _vmem_limit_bytes()

    options = []
    if _SINGLE_BUFFER_WEIGHTS[0] and hasattr(pl, "Buffered"):
        options.append(True)
    options.append(False)

    last_err = None
    for single_buf in options:
        weight_buffers = 1 if single_buf else 2
        tile_n = _pick_tile_n(N, Dp, w_itemsize, weight_buffers, vmem_limit,
                              row_align)
        Np = _round_up(N, tile_n)
        pad_n, pad_d = Np - N, Dp - D
        # Pad only when needed; padded cols stay zero through both matmuls
        # (relu(0 + 0*shift) chain), padded rows are garbage and sliced off.
        if pad_n or pad_d:
            x_p = jnp.pad(x.astype(jnp.float32), ((0, pad_n), (0, pad_d)))
        else:
            x_p = x.astype(jnp.float32)
        try:
            out_p = _call_kernel(x_p, prepared, tile_n, Np, Dp, single_buf,
                                 vmem_limit, out_dtype)
            out_p = jax.block_until_ready(out_p)
        except Exception as e:
            if single_buf:
                # pipeline_mode=Buffered(1) unsupported on this jax -> fall back.
                _SINGLE_BUFFER_WEIGHTS[0] = False
                last_err = e
                continue
            raise
        return out_p[:N, :D]
    raise last_err  # pragma: no cover


# -----------------------------------------------------------------------------
# Synthetic params + pure-JAX reference of the PyTorch eval-mode forward
# -----------------------------------------------------------------------------
def make_params(key, dim):
    ks = jax.random.split(key, 6)
    bound = 1.0 / jnp.sqrt(dim)
    return {
        "fc1_w": jax.random.uniform(ks[0], (dim, dim), jnp.float32, -bound, bound),
        "fc1_b": jax.random.uniform(ks[1], (dim,), jnp.float32, -bound, bound),
        "fc2_w": jax.random.uniform(ks[2], (dim, dim), jnp.float32, -bound, bound),
        "fc2_b": jax.random.uniform(ks[3], (dim,), jnp.float32, -bound, bound),
        "bn1_gamma": jnp.ones((dim,), jnp.float32),
        "bn1_beta": jnp.zeros((dim,), jnp.float32),
        "bn1_mean": jax.random.normal(ks[4], (dim,), jnp.float32) * 0.1,
        "bn1_var": jnp.ones((dim,), jnp.float32) * 1.2,
        "bn2_gamma": jnp.ones((dim,), jnp.float32) * 0.9,
        "bn2_beta": jnp.zeros((dim,), jnp.float32) + 0.05,
        "bn2_mean": jax.random.normal(ks[5], (dim,), jnp.float32) * 0.1,
        "bn2_var": jnp.ones((dim,), jnp.float32) * 0.8,
    }


def reference_forward(x, p, eps=1e-5):
    def bn(z, g, b, m, v):
        return (z - m) / jnp.sqrt(v + eps) * g + b
    h = x @ p["fc1_w"].T + p["fc1_b"]
    h = jnp.maximum(bn(h, p["bn1_gamma"], p["bn1_beta"], p["bn1_mean"], p["bn1_var"]), 0.0)
    o = h @ p["fc2_w"].T + p["fc2_b"]
    o = bn(o, p["bn2_gamma"], p["bn2_beta"], p["bn2_mean"], p["bn2_var"])
    return jnp.maximum(o + x, 0.0)


if __name__ == "__main__":
    N, DIM = 8, 32
    key = jax.random.PRNGKey(0)
    kx, kp = jax.random.split(key)
    x = jax.random.normal(kx, (N, DIM), jnp.float32)
    params = make_params(kp, DIM)

    ref = reference_forward(x, params)

    # Reference-precision path: f32 MXU inputs, tight tolerance.
    prep_f32 = prepare_params(params, precision="f32")
    out_f32 = jax.block_until_ready(residual_block_forward(x, prep_f32))
    assert out_f32.shape == (N, DIM)
    assert jnp.allclose(out_f32, ref, atol=2e-4, rtol=2e-4), \
        f"f32 max abs err {float(jnp.max(jnp.abs(out_f32 - ref)))}"

    # Fast path: bf16 MXU inputs, f32 accumulation -> looser tolerance.
    prep_bf16 = prepare_params(params, precision="bf16")
    out_bf16 = jax.block_until_ready(residual_block_forward(x, prep_bf16))
    assert out_bf16.shape == (N, DIM)
    assert jnp.allclose(out_bf16, ref, atol=5e-2, rtol=5e-2), \
        f"bf16 max abs err {float(jnp.max(jnp.abs(out_bf16 - ref)))}"

    print("KERNEL_OK")
</pallas_src>

<mosaic_0001>
module attributes {stable_mosaic.version = 11 : i64} {
  func.func @residual_block_kernel(%arg0: i32, %arg1: memref<8x128xf32, #tpu.memory_space<vmem>>, %arg2: memref<128x128xf32, #tpu.memory_space<vmem>>, %arg3: memref<1x128xf32, #tpu.memory_space<vmem>>, %arg4: memref<128x128xf32, #tpu.memory_space<vmem>>, %arg5: memref<1x128xf32, #tpu.memory_space<vmem>>, %arg6: memref<8x128xf32, #tpu.memory_space<vmem>>) attributes {dimension_semantics = [#tpu.dimension_semantics<parallel>], iteration_bounds = array<i64: 1>, scalar_prefetch = 0 : i64, scratch_operands = 0 : i64, tpu.core_type = #tpu.core_type<tc>, window_params = [{transform_indices = @transform_0, window_bounds = array<i64: 8, 128>}, {pipeline_mode = #tpu.pipeline_mode<synchronous>, transform_indices = @transform_1, window_bounds = array<i64: 128, 128>}, {pipeline_mode = #tpu.pipeline_mode<synchronous>, transform_indices = @transform_2, window_bounds = array<i64: 1, 128>}, {pipeline_mode = #tpu.pipeline_mode<synchronous>, transform_indices = @transform_3, window_bounds = array<i64: 128, 128>}, {pipeline_mode = #tpu.pipeline_mode<synchronous>, transform_indices = @transform_4, window_bounds = array<i64: 1, 128>}, {transform_indices = @transform_5, window_bounds = array<i64: 8, 128>}]} {
    %c0 = arith.constant 0 : index
    %c0_0 = arith.constant 0 : index
    %0 = vector.load %arg1[%c0, %c0_0] : memref<8x128xf32, #tpu.memory_space<vmem>>, vector<8x128xf32>
    %c0_1 = arith.constant 0 : index
    %c0_2 = arith.constant 0 : index
    %1 = vector.load %arg2[%c0_1, %c0_2] : memref<128x128xf32, #tpu.memory_space<vmem>>, vector<128x128xf32>
    %cst = arith.constant dense<0.000000e+00> : vector<8x128xf32>
    %2 = tpu.matmul %0, %1, %cst {dimension_numbers = #tpu.dot_dimension_numbers<[1], [0], [0], [1], [0, 0, 1, 1], [], []>} : vector<8x128xf32>, vector<128x128xf32>, vector<8x128xf32> -> vector<8x128xf32>
    %c0_3 = arith.constant 0 : index
    %c0_4 = arith.constant 0 : index
    %3 = vector.load %arg3[%c0_3, %c0_4] : memref<1x128xf32, #tpu.memory_space<vmem>>, vector<1x128xf32>
    %4 = vector.broadcast %3 : vector<1x128xf32> to vector<8x128xf32>
    %5 = arith.addf %2, %4 : vector<8x128xf32>
    %cst_5 = arith.constant 0.000000e+00 : f32
    %6 = vector.broadcast %cst_5 : f32 to vector<8x128xf32>
    %7 = arith.maximumf %5, %6 : vector<8x128xf32>
    %c0_6 = arith.constant 0 : index
    %c0_7 = arith.constant 0 : index
    %8 = vector.load %arg4[%c0_6, %c0_7] : memref<128x128xf32, #tpu.memory_space<vmem>>, vector<128x128xf32>
    %cst_8 = arith.constant dense<0.000000e+00> : vector<8x128xf32>
    %9 = tpu.matmul %7, %8, %cst_8 {dimension_numbers = #tpu.dot_dimension_numbers<[1], [0], [0], [1], [0, 0, 1, 1], [], []>} : vector<8x128xf32>, vector<128x128xf32>, vector<8x128xf32> -> vector<8x128xf32>
    %c0_9 = arith.constant 0 : index
    %c0_10 = arith.constant 0 : index
    %10 = vector.load %arg5[%c0_9, %c0_10] : memref<1x128xf32, #tpu.memory_space<vmem>>, vector<1x128xf32>
    %11 = vector.broadcast %10 : vector<1x128xf32> to vector<8x128xf32>
    %12 = arith.addf %9, %11 : vector<8x128xf32>
    %13 = arith.addf %12, %0 : vector<8x128xf32>
    %cst_11 = arith.constant 0.000000e+00 : f32
    %14 = vector.broadcast %cst_11 : f32 to vector<8x128xf32>
    %15 = arith.maximumf %13, %14 : vector<8x128xf32>
    %c0_12 = arith.constant 0 : index
    %c0_13 = arith.constant 0 : index
    %16 = vector.load %arg6[%c0_12, %c0_13] : memref<8x128xf32, #tpu.memory_space<vmem>>, vector<8x128xf32>
    tpu.vector_store %arg6[%c0_12, %c0_13], %15 {strides = array<i32>} : memref<8x128xf32, #tpu.memory_space<vmem>>, vector<8x128xf32>,
    return
  }
  func.func @transform_0(%arg0: i32) -> (i32, i32) {
    %c0_i32 = arith.constant 0 : i32
    %c0_i32_0 = arith.constant 0 : i32
    return %arg0, %c0_i32 : i32, i32
  }
  func.func @transform_1(%arg0: i32) -> (i32, i32) {
    %c0_i32 = arith.constant 0 : i32
    %c0_i32_0 = arith.constant 0 : i32
    %c0_i32_1 = arith.constant 0 : i32
    return %c0_i32, %c0_i32_0 : i32, i32
  }
  func.func @transform_2(%arg0: i32) -> (i32, i32) {
    %c0_i32 = arith.constant 0 : i32
    %c0_i32_0 = arith.constant 0 : i32
    %c0_i32_1 = arith.constant 0 : i32
    return %c0_i32, %c0_i32_0 : i32, i32
  }
  func.func @transform_3(%arg0: i32) -> (i32, i32) {
    %c0_i32 = arith.constant 0 : i32
    %c0_i32_0 = arith.constant 0 : i32
    %c0_i32_1 = arith.constant 0 : i32
    return %c0_i32, %c0_i32_0 : i32, i32
  }
  func.func @transform_4(%arg0: i32) -> (i32, i32) {
    %c0_i32 = arith.constant 0 : i32
    %c0_i32_0 = arith.constant 0 : i32
    %c0_i32_1 = arith.constant 0 : i32
    return %c0_i32, %c0_i32_0 : i32, i32
  }
  func.func @transform_5(%arg0: i32) -> (i32, i32) {
    %c0_i32 = arith.constant 0 : i32
    %c0_i32_0 = arith.constant 0 : i32
    return %arg0, %c0_i32 : i32, i32
  }
}

module attributes {stable_mosaic.version = 11 : i64} {
  func.func @residual_block_kernel(%arg0: i32, %arg1: memref<8x128xf32, #tpu.memory_space<vmem>>, %arg2: memref<128x128xf32, #tpu.memory_space<vmem>>, %arg3: memref<1x128xf32, #tpu.memory_space<vmem>>, %arg4: memref<128x128xf32, #tpu.memory_space<vmem>>, %arg5: memref<1x128xf32, #tpu.memory_space<vmem>>, %arg6: memref<8x128xf32, #tpu.memory_space<vmem>>) attributes {dimension_semantics = [#tpu.dimension_semantics<parallel>], iteration_bounds = array<i64: 1>, scalar_prefetch = 0 : i64, scratch_operands = 0 : i64, tpu.core_type = #tpu.core_type<tc>, window_params = [{transform_indices = @transform_0, window_bounds = array<i64: 8, 128>}, {pipeline_mode = #tpu.pipeline_mode<synchronous>, transform_indices = @transform_1, window_bounds = array<i64: 128, 128>}, {pipeline_mode = #tpu.pipeline_mode<synchronous>, transform_indices = @transform_2, window_bounds = array<i64: 1, 128>}, {pipeline_mode = #tpu.pipeline_mode<synchronous>, transform_indices = @transform_3, window_bounds = array<i64: 128, 128>}, {pipeline_mode = #tpu.pipeline_mode<synchronous>, transform_indices = @transform_4, window_bounds = array<i64: 1, 128>}, {transform_indices = @transform_5, window_bounds = array<i64: 8, 128>}]} {
    %c0 = arith.constant 0 : index
    %c0_0 = arith.constant 0 : index
    %0 = vector.load %arg1[%c0, %c0_0] : memref<8x128xf32, #tpu.memory_space<vmem>>, vector<8x128xf32>
    %c0_1 = arith.constant 0 : index
    %c0_2 = arith.constant 0 : index
    %1 = vector.load %arg2[%c0_1, %c0_2] : memref<128x128xf32, #tpu.memory_space<vmem>>, vector<128x128xf32>
    %cst = arith.constant dense<0.000000e+00> : vector<8x128xf32>
    %2 = tpu.matmul %0, %1, %cst {dimension_numbers = #tpu.dot_dimension_numbers<[1], [0], [0], [1], [0, 0, 1, 1], [], []>} : vector<8x128xf32>, vector<128x128xf32>, vector<8x128xf32> -> vector<8x128xf32>
    %c0_3 = arith.constant 0 : index
    %c0_4 = arith.constant 0 : index
    %3 = vector.load %arg3[%c0_3, %c0_4] : memref<1x128xf32, #tpu.memory_space<vmem>>, vector<1x128xf32>
    %4 = vector.broadcast %3 : vector<1x128xf32> to vector<8x128xf32>
    %5 = arith.addf %2, %4 : vector<8x128xf32>
    %cst_5 = arith.constant 0.000000e+00 : f32
    %6 = vector.broadcast %cst_5 : f32 to vector<8x128xf32>
    %7 = arith.maximumf %5, %6 : vector<8x128xf32>
    %c0_6 = arith.constant 0 : index
    %c0_7 = arith.constant 0 : index
    %8 = vector.load %arg4[%c0_6, %c0_7] : memref<128x128xf32, #tpu.memory_space<vmem>>, vector<128x128xf32>
    %cst_8 = arith.constant dense<0.000000e+00> : vector<8x128xf32>
    %9 = tpu.matmul %7, %8, %cst_8 {dimension_numbers = #tpu.dot_dimension_numbers<[1], [0], [0], [1], [0, 0, 1, 1], [], []>} : vector<8x128xf32>, vector<128x128xf32>, vector<8x128xf32> -> vector<8x128xf32>
    %c0_9 = arith.constant 0 : index
    %c0_10 = arith.constant 0 : index
    %10 = vector.load %arg5[%c0_9, %c0_10] : memref<1x128xf32, #tpu.memory_space<vmem>>, vector<1x128xf32>
    %11 = vector.broadcast %10 : vector<1x128xf32> to vector<8x128xf32>
    %12 = arith.addf %9, %11 : vector<8x128xf32>
    %13 = arith.addf %12, %0 : vector<8x128xf32>
    %cst_11 = arith.constant 0.000000e+00 : f32
    %14 = vector.broadcast %cst_11 : f32 to vector<8x128xf32>
    %15 = arith.maximumf %13, %14 : vector<8x128xf32>
    %c0_12 = arith.constant 0 : index
    %c0_13 = arith.constant 0 : index
    %16 = vector.load %arg6[%c0_12, %c0_13] : memref<8x128xf32, #tpu.memory_space<vmem>>, vector<8x128xf32>
    tpu.vector_store %arg6[%c0_12, %c0_13], %15 {strides = array<i32>} : memref<8x128xf32, #tpu.memory_space<vmem>>, vector<8x128xf32>,
    return
  }
  func.func @transform_0(%arg0: i32) -> (i32, i32) {
    %c0_i32 = arith.constant 0 : i32
    %c0_i32_0 = arith.constant 0 : i32
    return %arg0, %c0_i32 : i32, i32
  }
  func.func @transform_1(%arg0: i32) -> (i32, i32) {
    %c0_i32 = arith.constant 0 : i32
    %c0_i32_0 = arith.constant 0 : i32
    %c0_i32_1 = arith.constant 0 : i32
    return %c0_i32, %c0_i32_0 : i32, i32
  }
  func.func @transform_2(%arg0: i32) -> (i32, i32) {
    %c0_i32 = arith.constant 0 : i32
    %c0_i32_0 = arith.constant 0 : i32
    %c0_i32_1 = arith.constant 0 : i32
    return %c0_i32, %c0_i32_0 : i32, i32
  }
  func.func @transform_3(%arg0: i32) -> (i32, i32) {
    %c0_i32 = arith.constant 0 : i32
    %c0_i32_0 = arith.constant 0 : i32
    %c0_i32_1 = arith.constant 0 : i32
    return %c0_i32, %c0_i32_0 : i32, i32
  }
  func.func @transform_4(%arg0: i32) -> (i32, i32) {
    %c0_i32 = arith.constant 0 : i32
    %c0_i32_0 = arith.constant 0 : i32
    %c0_i32_1 = arith.constant 0 : i32
    return %c0_i32, %c0_i32_0 : i32, i32
  }
  func.func @transform_5(%arg0: i32) -> (i32, i32) {
    %c0_i32 = arith.constant 0 : i32
    %c0_i32_0 = arith.constant 0 : i32
    return %arg0, %c0_i32 : i32, i32
  }
}

</mosaic_0001>

<bundles_post_ra>
// kernel: tpu_custom_call.1
= control target key start
LH: loop header
LB: loop body
LE: loop exit
PB: predicated region body
PF: predicated region fallthrough
CT: control target
= control target key end

     0   :  { %10 = vsyncpa [#allocation3], 0  ;;  %s333_s0 = inlined_call_operand.hbm [shape: f32[8,128], index: 0, kind: input, shape index: {}]   ;;  %s334_s1 = inlined_call_operand.hbm [shape: f32[128,128], index: 1, kind: input, shape index: {}]   ;;  %s335_s2 = inlined_call_operand.vmem [shape: f32[1,128], index: 2, kind: input, shape index: {}]   ;;  %s336_s3 = inlined_call_operand.hbm [shape: f32[128,128], index: 3, kind: input, shape index: {}]   ;;  %s337_s4 = inlined_call_operand.vmem [shape: f32[1,128], index: 4, kind: input, shape index: {}]   ;;  %s338_s5 = inlined_call_operand.hbm [shape: f32[8,128], index: 5, kind: output, shape index: {}]  }
   0x1   :  { %11 = vsyncpa [#allocation6], 0  ;;  %s28_s20 = sshll.u32 %s334_s1, 4  ;;  %s29_s20 = int_to_ptr.hbm [resolvable:$true] %s28_s20 }
   0x2   :  { %12 = vsyncpa [#allocation4], 0  ;;  %s279_s21 = smov [#allocation5]   ;;  %s18_s25 = sshll.u32 %s333_s0, 4  ;;  %s19_s25 = int_to_ptr.hbm [resolvable:$true] %s18_s25 }
   0x3   :  { %s30_s22 = sshll.u32 %s279_s21, 4  ;;  %s280_s26 = smov 128   ;;  %s31_s22 = int_to_ptr.vmem [resolvable:$true] %s30_s22 }
   0x4   :  { %s281_s27 = smov 8   ;;  %s282_s28 = smov [#allocation2]  }
   0x5   :  { %36 = dma.hbm_to_vmem [thread:$0]  %s29_s20, 2048, %s31_s22, [#allocation6], %s280_s26, %s280_s26, %s281_s27  }
   0x6   :  { %s20_s29 = sshll.u32 %s282_s28, 4  ;;  %s43_s7 = sshll.u32 %s336_s3, 4  ;;  %s21_s29 = int_to_ptr.vmem [resolvable:$true] %s20_s29  ;;  %s44_s7 = int_to_ptr.hbm [resolvable:$true] %s43_s7 }
   0x7   :  { %23 = dma.hbm_to_vmem [thread:$0]  %s19_s25, 128, %s21_s29, [#allocation3]  }
   0x8   :  { %s283_s1 = smov [#allocation7]  }
   0x9   :  { %s45_s8 = sshll.u32 %s283_s1, 4  ;;  %s46_s8 = int_to_ptr.vmem [resolvable:$true] %s45_s8 }
   0xa   :  { %51 = dma.hbm_to_vmem [thread:$0]  %s44_s7, 2048, %s46_s8, [#allocation6], %s280_s26, %s280_s26, %s281_s27  }
   0xb   :  { %273 = dma.done.wait [#allocation3], 128  }
   0xc   :  { %274 = vsyncadd [#allocation3], 4294967168 }
   0xd   :  { %275 = dma.done.wait [#allocation6], 4096  }
   0xe   :  { %276 = vsyncadd [#allocation6], 4294963200  ;;  %v82_v0 = vld [vmem:[#allocation5 + $0x78] sm:$0xff]  ;;  %v81_v1 = vld [vmem:[#allocation5 + $0x70] sm:$0xff]  ;;  %s284_s11 = smov [#allocation8]   ;;  %s158_s15 = sshll.u32 %s338_s5, 4  ;;  %s159_s15 = int_to_ptr.hbm [resolvable:$true] %s158_s15 }
   0xf   :  { %87 = vmatpush.msra.mxu0 %v82_v0  ;;  %v80_v2 = vld [vmem:[#allocation5 + $0x68] sm:$0xff]  ;;  %v79_v3 = vld [vmem:[#allocation5 + $0x60] sm:$0xff]  ;;  %v123_v4 = vld [vmem:[#allocation7 + $0x78] sm:$0xff]  ;;  %s156_s12 = sshll.u32 %s284_s11, 4  ;;  %s157_s12 = int_to_ptr.vmem [resolvable:$true] %s156_s12 }
  0x10   :  { %v78_v5 = vld [vmem:[#allocation5 + $0x58] sm:$0xff]  ;;  %128 = vmatpush.msra.mxu1 %v123_v4  ;;  %v122_v6 = vld [vmem:[#allocation7 + $0x70] sm:$0xff]  ;;  %v121_v7 = vld [vmem:[#allocation7 + $0x68] sm:$0xff] }
  0x11   :  { %88 = vmatpush.msra.mxu0 %v81_v1  ;;  %v77_v8 = vld [vmem:[#allocation5 + $0x50] sm:$0xff]  ;;  %v120_v9 = vld [vmem:[#allocation7 + $0x60] sm:$0xff]  ;;  %v76_v10 = vld [vmem:[#allocation5 + $0x48] sm:$0xff] }
  0x12   :  { %129 = vmatpush.msra.mxu1 %v122_v6  ;;  %v119_v11 = vld [vmem:[#allocation7 + $0x58] sm:$0xff]  ;;  %v75_v12 = vld [vmem:[#allocation5 + $0x40] sm:$0xff]  ;;  %v118_v13 = vld [vmem:[#allocation7 + $0x50] sm:$0xff] }
  0x13   :  { %89 = vmatpush.msra.mxu0 %v80_v2  ;;  %v74_v14 = vld [vmem:[#allocation5 + $0x38] sm:$0xff]  ;;  %v117_v15 = vld [vmem:[#allocation7 + $0x48] sm:$0xff]  ;;  %v73_v16 = vld [vmem:[#allocation5 + $0x30] sm:$0xff] }
  0x14   :  { %130 = vmatpush.msra.mxu1 %v121_v7  ;;  %v116_v17 = vld [vmem:[#allocation7 + $0x40] sm:$0xff]  ;;  %v72_v18 = vld [vmem:[#allocation5 + $0x28] sm:$0xff]  ;;  %v115_v19 = vld [vmem:[#allocation7 + $0x38] sm:$0xff] }
  0x15   :  { %90 = vmatpush.msra.mxu0 %v79_v3  ;;  %v71_v20 = vld [vmem:[#allocation5 + $0x20] sm:$0xff]  ;;  %v114_v21 = vld [vmem:[#allocation7 + $0x30] sm:$0xff]  ;;  %v70_v22 = vld [vmem:[#allocation5 + $0x18] sm:$0xff] }
  0x16   :  { %131 = vmatpush.msra.mxu1 %v120_v9  ;;  %v113_v23 = vld [vmem:[#allocation7 + $0x28] sm:$0xff]  ;;  %v69_v24 = vld [vmem:[#allocation5 + $0x10] sm:$0xff]  ;;  %v112_v25 = vld [vmem:[#allocation7 + $0x20] sm:$0xff] }
  0x17   :  { %91 = vmatpush.msra.mxu0 %v78_v5  ;;  %v68_v26 = vld [vmem:[#allocation5 + $0x8] sm:$0xff]  ;;  %v111_v27 = vld [vmem:[#allocation7 + $0x18] sm:$0xff]  ;;  %v67_v28 = vld [vmem:[#allocation5] sm:$0xff] }
  0x18   :  { %132 = vmatpush.msra.mxu1 %v119_v11  ;;  %v66_v29 = vld [vmem:[#allocation2] sm:$0xff]  ;;  %v110_v30 = vld [vmem:[#allocation7 + $0x10] sm:$0xff]  ;;  %v109_v31 = vld [vmem:[#allocation7 + $0x8] sm:$0xff] }
  0x19   :  { %92 = vmatpush.msra.mxu0 %v77_v8  ;;  %v108_v32 = vld [vmem:[#allocation7] sm:$0xff]  ;;  %v175_v33 = vld [vmem:[%s335_s2] ss:$0 sm:$0xff] }
  0x1a   :  { %133 = vmatpush.msra.mxu1 %v118_v13  ;;  %v176_v37 = vld [vmem:[%s337_s4] ss:$0 sm:$0xff] }
  0x1b   :  { %93 = vmatpush.msra.mxu0 %v76_v10 }
  0x1c   :  { %134 = vmatpush.msra.mxu1 %v117_v15 }
  0x1d   :  { %94 = vmatpush.msra.mxu0 %v75_v12 }
  0x1e   :  { %135 = vmatpush.msra.mxu1 %v116_v17 }
  0x1f   :  { %95 = vmatpush.msra.mxu0 %v74_v14 }
  0x20   :  { %136 = vmatpush.msra.mxu1 %v115_v19 }
  0x21   :  { %96 = vmatpush.msra.mxu0 %v73_v16 }
  0x22   :  { %137 = vmatpush.msra.mxu1 %v114_v21 }
  0x23   :  { %97 = vmatpush.msra.mxu0 %v72_v18 }
  0x24   :  { %138 = vmatpush.msra.mxu1 %v113_v23 }
  0x25   :  { %98 = vmatpush.msra.mxu0 %v71_v20 }
  0x26   :  { %139 = vmatpush.msra.mxu1 %v112_v25 }
  0x27   :  { %99 = vmatpush.msra.mxu0 %v70_v22 }
  0x28   :  { %140 = vmatpush.msra.mxu1 %v111_v27 }
  0x29   :  { %100 = vmatpush.msra.mxu0 %v69_v24 }
  0x2a   :  { %141 = vmatpush.msra.mxu1 %v110_v30 }
  0x2b   :  { %101 = vmatpush.msra.mxu0 %v68_v26 }
  0x2c   :  { %142 = vmatpush.msra.mxu1 %v109_v31 }
  0x2d   :  { %102 = vmatpush.msra.mxu0 %v67_v28 }
  0x2e   :  { %103 = vmatmul.f32.vlgmr.msra.gmra.mxu0 %v66_v29  ;;  %143 = vmatpush.msra.mxu1 %v108_v32 }
  0xab   :  { %v104_v34 = vpop.f32.mrf.mxu0 }
  0xac   :  { %v105_v35 = vadd.f32 %v175_v33, %v104_v34 }
  0xae   :  { %v107_v36 = vmax.f32 %v105_v35, 0.0 }
  0xb0   :  { %144 = vmatmul.f32.vlgmr.msra.gmra.mxu1 %v107_v36 }
 0x12d   :  { %v145_v38 = vpop.f32.mrf.mxu1 }
 0x12e   :  { %v146_v39 = vadd.f32 %v176_v37, %v145_v38 }
 0x130   :  { %v148_v40 = vadd.f32 %v146_v39, %v66_v29 }
 0x132   :  { %v149_v41 = vmax.f32 %v148_v40, 0.0 }
 0x134   :  { %150 = vst [vmem:[#allocation8] sm:$0xff] %v149_v41 }
 0x135   :  { %161 = dma.vmem_to_hbm [thread:$0]  %s157_s12, 128, %s159_s15, [#allocation4]  }
 0x136   :  { %277 = dma.done.wait [#allocation4], 128  }
 0x137   :  { %278 = vsyncadd [#allocation4], 4294967168 }
 0x138   :  { %166 = vsyncpa [#allocation3], 1 }
 0x139   :  { %167 = vsyncpa [#allocation6], 1 }
 0x13a   :  { %168 = vsyncpa [#allocation4], 1 }

// kernel: tpu_custom_call.1
= control target key start
LH: loop header
LB: loop body
LE: loop exit
PB: predicated region body
PF: predicated region fallthrough
CT: control target
= control target key end

     0   :  { %10 = vsyncpa [#allocation3], 0  ;;  %s333_s0 = inlined_call_operand.hbm [shape: f32[8,128], index: 0, kind: input, shape index: {}]   ;;  %s334_s1 = inlined_call_operand.hbm [shape: f32[128,128], index: 1, kind: input, shape index: {}]   ;;  %s335_s2 = inlined_call_operand.vmem [shape: f32[1,128], index: 2, kind: input, shape index: {}]   ;;  %s336_s3 = inlined_call_operand.hbm [shape: f32[128,128], index: 3, kind: input, shape index: {}]   ;;  %s337_s4 = inlined_call_operand.vmem [shape: f32[1,128], index: 4, kind: input, shape index: {}]   ;;  %s338_s5 = inlined_call_operand.hbm [shape: f32[8,128], index: 5, kind: output, shape index: {}]  }
   0x1   :  { %11 = vsyncpa [#allocation6], 0  ;;  %s28_s20 = sshll.u32 %s334_s1, 4  ;;  %s29_s20 = int_to_ptr.hbm [resolvable:$true] %s28_s20 }
   0x2   :  { %12 = vsyncpa [#allocation4], 0  ;;  %s279_s21 = smov [#allocation5]   ;;  %s18_s25 = sshll.u32 %s333_s0, 4  ;;  %s19_s25 = int_to_ptr.hbm [resolvable:$true] %s18_s25 }
   0x3   :  { %s30_s22 = sshll.u32 %s279_s21, 4  ;;  %s280_s26 = smov 128   ;;  %s31_s22 = int_to_ptr.vmem [resolvable:$true] %s30_s22 }
   0x4   :  { %s281_s27 = smov 8   ;;  %s282_s28 = smov [#allocation2]  }
   0x5   :  { %36 = dma.hbm_to_vmem [thread:$0]  %s29_s20, 2048, %s31_s22, [#allocation6], %s280_s26, %s280_s26, %s281_s27  }
   0x6   :  { %s20_s29 = sshll.u32 %s282_s28, 4  ;;  %s43_s7 = sshll.u32 %s336_s3, 4  ;;  %s21_s29 = int_to_ptr.vmem [resolvable:$true] %s20_s29  ;;  %s44_s7 = int_to_ptr.hbm [resolvable:$true] %s43_s7 }
   0x7   :  { %23 = dma.hbm_to_vmem [thread:$0]  %s19_s25, 128, %s21_s29, [#allocation3]  }
   0x8   :  { %s283_s1 = smov [#allocation7]  }
   0x9   :  { %s45_s8 = sshll.u32 %s283_s1, 4  ;;  %s46_s8 = int_to_ptr.vmem [resolvable:$true] %s45_s8 }
   0xa   :  { %51 = dma.hbm_to_vmem [thread:$0]  %s44_s7, 2048, %s46_s8, [#allocation6], %s280_s26, %s280_s26, %s281_s27  }
   0xb   :  { %273 = dma.done.wait [#allocation3], 128  }
   0xc   :  { %274 = vsyncadd [#allocation3], 4294967168 }
   0xd   :  { %275 = dma.done.wait [#allocation6], 4096  }
   0xe   :  { %276 = vsyncadd [#allocation6], 4294963200  ;;  %v82_v0 = vld [vmem:[#allocation5 + $0x78] sm:$0xff]  ;;  %v81_v1 = vld [vmem:[#allocation5 + $0x70] sm:$0xff]  ;;  %s284_s11 = smov [#allocation8]   ;;  %s158_s15 = sshll.u32 %s338_s5, 4  ;;  %s159_s15 = int_to_ptr.hbm [resolvable:$true] %s158_s15 }
   0xf   :  { %87 = vmatpush.msra.mxu0 %v82_v0  ;;  %v80_v2 = vld [vmem:[#allocation5 + $0x68] sm:$0xff]  ;;  %v79_v3 = vld [vmem:[#allocation5 + $0x60] sm:$0xff]  ;;  %v123_v4 = vld [vmem:[#allocation7 + $0x78] sm:$0xff]  ;;  %s156_s12 = sshll.u32 %s284_s11, 4  ;;  %s157_s12 = int_to_ptr.vmem [resolvable:$true] %s156_s12 }
  0x10   :  { %v78_v5 = vld [vmem:[#allocation5 + $0x58] sm:$0xff]  ;;  %128 = vmatpush.msra.mxu1 %v123_v4  ;;  %v122_v6 = vld [vmem:[#allocation7 + $0x70] sm:$0xff]  ;;  %v121_v7 = vld [vmem:[#allocation7 + $0x68] sm:$0xff] }
  0x11   :  { %88 = vmatpush.msra.mxu0 %v81_v1  ;;  %v77_v8 = vld [vmem:[#allocation5 + $0x50] sm:$0xff]  ;;  %v120_v9 = vld [vmem:[#allocation7 + $0x60] sm:$0xff]  ;;  %v76_v10 = vld [vmem:[#allocation5 + $0x48] sm:$0xff] }
  0x12   :  { %129 = vmatpush.msra.mxu1 %v122_v6  ;;  %v119_v11 = vld [vmem:[#allocation7 + $0x58] sm:$0xff]  ;;  %v75_v12 = vld [vmem:[#allocation5 + $0x40] sm:$0xff]  ;;  %v118_v13 = vld [vmem:[#allocation7 + $0x50] sm:$0xff] }
  0x13   :  { %89 = vmatpush.msra.mxu0 %v80_v2  ;;  %v74_v14 = vld [vmem:[#allocation5 + $0x38] sm:$0xff]  ;;  %v117_v15 = vld [vmem:[#allocation7 + $0x48] sm:$0xff]  ;;  %v73_v16 = vld [vmem:[#allocation5 + $0x30] sm:$0xff] }
  0x14   :  { %130 = vmatpush.msra.mxu1 %v121_v7  ;;  %v116_v17 = vld [vmem:[#allocation7 + $0x40] sm:$0xff]  ;;  %v72_v18 = vld [vmem:[#allocation5 + $0x28] sm:$0xff]  ;;  %v115_v19 = vld [vmem:[#allocation7 + $0x38] sm:$0xff] }
  0x15   :  { %90 = vmatpush.msra.mxu0 %v79_v3  ;;  %v71_v20 = vld [vmem:[#allocation5 + $0x20] sm:$0xff]  ;;  %v114_v21 = vld [vmem:[#allocation7 + $0x30] sm:$0xff]  ;;  %v70_v22 = vld [vmem:[#allocation5 + $0x18] sm:$0xff] }
  0x16   :  { %131 = vmatpush.msra.mxu1 %v120_v9  ;;  %v113_v23 = vld [vmem:[#allocation7 + $0x28] sm:$0xff]  ;;  %v69_v24 = vld [vmem:[#allocation5 + $0x10] sm:$0xff]  ;;  %v112_v25 = vld [vmem:[#allocation7 + $0x20] sm:$0xff] }
  0x17   :  { %91 = vmatpush.msra.mxu0 %v78_v5  ;;  %v68_v26 = vld [vmem:[#allocation5 + $0x8] sm:$0xff]  ;;  %v111_v27 = vld [vmem:[#allocation7 + $0x18] sm:$0xff]  ;;  %v67_v28 = vld [vmem:[#allocation5] sm:$0xff] }
  0x18   :  { %132 = vmatpush.msra.mxu1 %v119_v11  ;;  %v66_v29 = vld [vmem:[#allocation2] sm:$0xff]  ;;  %v110_v30 = vld [vmem:[#allocation7 + $0x10] sm:$0xff]  ;;  %v109_v31 = vld [vmem:[#allocation7 + $0x8] sm:$0xff] }
  0x19   :  { %92 = vmatpush.msra.mxu0 %v77_v8  ;;  %v108_v32 = vld [vmem:[#allocation7] sm:$0xff]  ;;  %v175_v33 = vld [vmem:[%s335_s2] ss:$0 sm:$0xff] }
  0x1a   :  { %133 = vmatpush.msra.mxu1 %v118_v13  ;;  %v176_v37 = vld [vmem:[%s337_s4] ss:$0 sm:$0xff] }
  0x1b   :  { %93 = vmatpush.msra.mxu0 %v76_v10 }
  0x1c   :  { %134 = vmatpush.msra.mxu1 %v117_v15 }
  0x1d   :  { %94 = vmatpush.msra.mxu0 %v75_v12 }
  0x1e   :  { %135 = vmatpush.msra.mxu1 %v116_v17 }
  0x1f   :  { %95 = vmatpush.msra.mxu0 %v74_v14 }
  0x20   :  { %136 = vmatpush.msra.mxu1 %v115_v19 }
  0x21   :  { %96 = vmatpush.msra.mxu0 %v73_v16 }
  0x22   :  { %137 = vmatpush.msra.mxu1 %v114_v21 }
  0x23   :  { %97 = vmatpush.msra.mxu0 %v72_v18 }
  0x24   :  { %138 = vmatpush.msra.mxu1 %v113_v23 }
  0x25   :  { %98 = vmatpush.msra.mxu0 %v71_v20 }
  0x26   :  { %139 = vmatpush.msra.mxu1 %v112_v25 }
  0x27   :  { %99 = vmatpush.msra.mxu0 %v70_v22 }
  0x28   :  { %140 = vmatpush.msra.mxu1 %v111_v27 }
  0x29   :  { %100 = vmatpush.msra.mxu0 %v69_v24 }
  0x2a   :  { %141 = vmatpush.msra.mxu1 %v110_v30 }
  0x2b   :  { %101 = vmatpush.msra.mxu0 %v68_v26 }
  0x2c   :  { %142 = vmatpush.msra.mxu1 %v109_v31 }
  0x2d   :  { %102 = vmatpush.msra.mxu0 %v67_v28 }
  0x2e   :  { %103 = vmatmul.f32.vlgmr.msra.gmra.mxu0 %v66_v29  ;;  %143 = vmatpush.msra.mxu1 %v108_v32 }
  0xab   :  { %v104_v34 = vpop.f32.mrf.mxu0 }
  0xac   :  { %v105_v35 = vadd.f32 %v175_v33, %v104_v34 }
  0xae   :  { %v107_v36 = vmax.f32 %v105_v35, 0.0 }
  0xb0   :  { %144 = vmatmul.f32.vlgmr.msra.gmra.mxu1 %v107_v36 }
 0x12d   :  { %v145_v38 = vpop.f32.mrf.mxu1 }
 0x12e   :  { %v146_v39 = vadd.f32 %v176_v37, %v145_v38 }
 0x130   :  { %v148_v40 = vadd.f32 %v146_v39, %v66_v29 }
 0x132   :  { %v149_v41 = vmax.f32 %v148_v40, 0.0 }
 0x134   :  { %150 = vst [vmem:[#allocation8] sm:$0xff] %v149_v41 }
 0x135   :  { %161 = dma.vmem_to_hbm [thread:$0]  %s157_s12, 128, %s159_s15, [#allocation4]  }
 0x136   :  { %277 = dma.done.wait [#allocation4], 128  }
 0x137   :  { %278 = vsyncadd [#allocation4], 4294967168 }
 0x138   :  { %166 = vsyncpa [#allocation3], 1 }
 0x139   :  { %167 = vsyncpa [#allocation6], 1 }
 0x13a   :  { %168 = vsyncpa [#allocation4], 1 }

</bundles_post_ra>
